<compile_context>
chip_gen: v7x
topology: tpu7x:2x2x1
jax: 0.10.0
libtpu: 0.0.40
codegen_flags: <defaults>
</compile_context>

<pallas_src>
import jax
import jax.numpy as jnp
from jax.experimental import pallas as pl
from jax.experimental.pallas import tpu as pltpu


# ---------------------------------------------------------------------------
# Kernels
# ---------------------------------------------------------------------------

def _se_kernel_nchw(x_ref, w1_ref, w2_ref, o_ref):
    """NCHW-native block: x_ref / o_ref (Bt, C, HW); w1 (C, Cr); w2 (Cr, C)."""
    x = x_ref[...]
    # Squeeze: global average pool over HW (lane axis), f32 accumulator only.
    pooled = jnp.mean(x, axis=-1, dtype=jnp.float32)                      # (Bt, C)
    # Excitation: FC -> ReLU -> FC -> sigmoid, batched over the Bt rows (MXU).
    h = jnp.dot(pooled, w1_ref[...].astype(jnp.float32),
                preferred_element_type=jnp.float32)                       # (Bt, Cr)
    h = jnp.maximum(h, 0.0)
    s = jnp.dot(h, w2_ref[...].astype(jnp.float32),
                preferred_element_type=jnp.float32)                       # (Bt, C)
    gate = jax.nn.sigmoid(s)                                              # EUP slot
    # Scale: per-channel gate broadcast along the HW lane axis; multiply in the
    # I/O dtype so no f32 shadow of the (Bt, C, HW) tile is materialized.
    o_ref[...] = x * gate.astype(o_ref.dtype)[:, :, None]


def _se_kernel_nhwc(x_ref, w1_ref, w2_ref, o_ref):
    """Channels-last block: x_ref / o_ref (Bt, HW, C); w1 (C, Cr); w2 (Cr, C)."""
    x = x_ref[...]
    pooled = jnp.mean(x, axis=1, dtype=jnp.float32)                       # (Bt, C)
    h = jnp.dot(pooled, w1_ref[...].astype(jnp.float32),
                preferred_element_type=jnp.float32)                       # (Bt, Cr)
    h = jnp.maximum(h, 0.0)
    s = jnp.dot(h, w2_ref[...].astype(jnp.float32),
                preferred_element_type=jnp.float32)                       # (Bt, C)
    gate = jax.nn.sigmoid(s)
    o_ref[...] = x * gate.astype(o_ref.dtype)[:, None, :]


# ---------------------------------------------------------------------------
# Tiling / launch helpers
# ---------------------------------------------------------------------------

def _vmem_capacity_bytes():
    """Physical VMEM per core; conservative 64 MiB (v7x) if the query fails."""
    try:
        return int(pltpu.get_tpu_info().vmem_capacity_bytes)
    except Exception:
        return 64 << 20


def _pick_batch_tile(batch, slab_bytes, max_block_bytes, target_steps=4):
    """Largest divisor `bt` of `batch` such that the block stays under
    `max_block_bytes` while keeping >= min(target_steps, batch) grid steps, so
    fetch/compute/writeback overlap per core and both v7x TensorCores get >=2
    steps each under the "parallel" batch axis."""
    need_steps = min(target_steps, batch)
    best = 1
    for bt in range(1, batch + 1):
        if batch % bt:
            continue
        if bt * slab_bytes > max_block_bytes:
            break
        if batch // bt >= need_steps:
            best = bt
    return best


def _launch(kernel, x3, w1_t, w2_t, batch_tile):
    """x3: (B, S, L) already in the kernel's native block layout."""
    B, S, L = x3.shape
    C, Cr = w1_t.shape
    itemsize = jnp.dtype(x3.dtype).itemsize
    slab_bytes = S * L * itemsize
    w_bytes = (C * Cr + Cr * C) * jnp.dtype(w1_t.dtype).itemsize

    # Chip-aware budgets: claim ~75% of physical VMEM; within it budget the
    # double-buffered in/out blocks (4x block), weights, and compiler scratch.
    vmem_phys = _vmem_capacity_bytes()
    budget = (3 * vmem_phys) // 4                       # 96 MiB on v5e/v6e, 48 MiB on v7x
    max_block_bytes = max((budget - 2 * w_bytes - (2 << 20)) // 4, 1 << 20)

    if batch_tile is None:
        batch_tile = _pick_batch_tile(B, slab_bytes, max_block_bytes)
    assert B % batch_tile == 0
    grid = (B // batch_tile,)
    block_bytes = batch_tile * slab_bytes

    vmem_need = 4 * block_bytes + 2 * w_bytes + (2 << 20)
    vmem_limit = int(min(max(vmem_need, 32 << 20), budget))
    # TODO(synk): if even a single batch row (4*slab_bytes) exceeds `budget`
    # (giant early-stage feature maps on v7x), tile the HW axis in-kernel with a
    # manually double-buffered pool-then-scale pass instead of one monolithic block.

    # Weights are grid-invariant; for large C don't burn VMEM double-buffering them.
    if w_bytes > (1 << 20):
        w1_spec = pl.BlockSpec((C, Cr), lambda b: (0, 0), pipeline_mode=pl.Buffered(1))
        w2_spec = pl.BlockSpec((Cr, C), lambda b: (0, 0), pipeline_mode=pl.Buffered(1))
    else:
        w1_spec = pl.BlockSpec((C, Cr), lambda b: (0, 0))
        w2_spec = pl.BlockSpec((Cr, C), lambda b: (0, 0))

    cost = pl.CostEstimate(
        flops=int(2 * B * S * L + 4 * B * C * Cr),
        transcendentals=int(B * C),
        bytes_accessed=int(2 * B * S * L * itemsize + w_bytes),
    )

    return pl.pallas_call(
        kernel,
        out_shape=jax.ShapeDtypeStruct((B, S, L), x3.dtype),
        grid_spec=pltpu.PrefetchScalarGridSpec(
            num_scalar_prefetch=0,
            grid=grid,
            in_specs=[
                pl.BlockSpec((batch_tile, S, L), lambda b: (b, 0, 0)),
                w1_spec,
                w2_spec,
            ],
            out_specs=pl.BlockSpec((batch_tile, S, L), lambda b: (b, 0, 0)),
        ),
        compiler_params=pltpu.CompilerParams(
            dimension_semantics=("parallel",),
            vmem_limit_bytes=vmem_limit,
        ),
        cost_estimate=cost,
    )(x3, w1_t, w2_t)


# ---------------------------------------------------------------------------
# Public entry points
# ---------------------------------------------------------------------------

def se_block_nchw(x_nchw, w1_t, w2_t, *, batch_tile=None):
    """SE forward on NCHW input (matches the PyTorch module).
    w1_t: (C, C//r), w2_t: (C//r, C) -- nn.Linear weights pre-transposed.
    Only free reshapes in the wrapper: no transposes, no extra HBM passes."""
    B, C, H, W = x_nchw.shape
    x3 = x_nchw.reshape(B, C, H * W)                 # free (contiguous collapse)
    out3 = _launch(_se_kernel_nchw, x3, w1_t, w2_t, batch_tile)
    return out3.reshape(B, C, H, W)


def se_block_nhwc(x_nhwc, w1_t, w2_t, *, batch_tile=None):
    """SE forward on NHWC input (channels-last pipelines): C on the lane axis.
    If C % 128 != 0, channels and weights are zero-padded so stores stay
    lane-dense/unmasked; the pad is sliced off at the end."""
    B, H, W, C = x_nhwc.shape
    pad = (-C) % 128
    Cp = C + pad
    if pad:
        x_nhwc = jnp.pad(x_nhwc, ((0, 0), (0, 0), (0, 0), (0, pad)))
        w1_t = jnp.pad(w1_t, ((0, pad), (0, 0)))     # padded pooled rows are 0
        w2_t = jnp.pad(w2_t, ((0, 0), (0, pad)))     # padded gates multiply zeros
    x3 = x_nhwc.reshape(B, H * W, Cp)                # free (contiguous collapse)
    out3 = _launch(_se_kernel_nhwc, x3, w1_t, w2_t, batch_tile)
    out = out3.reshape(B, H, W, Cp)
    return out[..., :C] if pad else out


def reference_se_block(x, w1_t, w2_t):
    """Pure-JAX NCHW reference mirroring the PyTorch forward."""
    y = jnp.mean(x, axis=(2, 3))                     # (B, C)
    y = jnp.maximum(y @ w1_t, 0.0)                   # (B, Cr)
    y = jax.nn.sigmoid(y @ w2_t)                     # (B, C)
    return x * y[:, :, None, None]


if __name__ == "__main__":
    key = jax.random.PRNGKey(0)
    k1, k2, k3, k4, k5 = jax.random.split(key, 5)
    reduction = 16

    # --- NCHW path (the PyTorch module's layout), f32 ---
    B, C, H, W = 8, 128, 8, 8
    Cr = C // reduction
    x = jax.random.normal(k1, (B, C, H, W), dtype=jnp.float32)
    # nn.Linear stores (out, in); weights are passed pre-transposed so the
    # kernel does plain y @ W.
    w1_t = jax.random.normal(k2, (C, Cr), dtype=jnp.float32) * 0.1
    w2_t = jax.random.normal(k3, (Cr, C), dtype=jnp.float32) * 0.1

    out = se_block_nchw(x, w1_t, w2_t)
    jax.block_until_ready(out)
    ref = reference_se_block(x, w1_t, w2_t)
    err = float(jnp.max(jnp.abs(out - ref)))
    assert out.shape == x.shape
    assert jnp.allclose(out, ref, atol=1e-4, rtol=1e-4), f"nchw f32 mismatch, max|diff|={err}"

    # --- NCHW path, bf16 I/O (gate computed in f32, scale applied in bf16) ---
    xb = x.astype(jnp.bfloat16)
    outb = se_block_nchw(xb, w1_t.astype(jnp.bfloat16), w2_t.astype(jnp.bfloat16))
    jax.block_until_ready(outb)
    refb = reference_se_block(xb.astype(jnp.float32), w1_t, w2_t)
    errb = float(jnp.max(jnp.abs(outb.astype(jnp.float32) - refb)))
    assert outb.shape == x.shape
    assert errb < 5e-2, f"nchw bf16 mismatch, max|diff|={errb}"

    # --- NHWC path with C not a multiple of 128 (exercises channel padding) ---
    B2, H2, W2, C2 = 4, 4, 4, 96
    Cr2 = C2 // reduction
    x2 = jax.random.normal(k4, (B2, H2, W2, C2), dtype=jnp.float32)
    w1b = jax.random.normal(k5, (C2, Cr2), dtype=jnp.float32) * 0.1
    w2b = jax.random.normal(k1, (Cr2, C2), dtype=jnp.float32) * 0.1
    out2 = se_block_nhwc(x2, w1b, w2b)
    jax.block_until_ready(out2)
    ref2 = jnp.transpose(
        reference_se_block(jnp.transpose(x2, (0, 3, 1, 2)), w1b, w2b), (0, 2, 3, 1))
    err2 = float(jnp.max(jnp.abs(out2 - ref2)))
    assert out2.shape == x2.shape
    assert jnp.allclose(out2, ref2, atol=1e-4, rtol=1e-4), f"nhwc mismatch, max|diff|={err2}"

    print("KERNEL_OK")
</pallas_src>

<mosaic_0001>
module attributes {stable_mosaic.version = 11 : i64} {
  func.func @_se_kernel_nchw(%arg0: i32, %arg1: memref<2x128x64xf32, #tpu.memory_space<vmem>>, %arg2: memref<128x8xf32, #tpu.memory_space<vmem>>, %arg3: memref<8x128xf32, #tpu.memory_space<vmem>>, %arg4: memref<2x128x64xf32, #tpu.memory_space<vmem>>) attributes {dimension_semantics = [#tpu.dimension_semantics<parallel>], iteration_bounds = array<i64: 4>, scalar_prefetch = 0 : i64, scratch_operands = 0 : i64, tpu.core_type = #tpu.core_type<tc>, window_params = [{transform_indices = @transform_0, window_bounds = array<i64: 2, 128, 64>}, {pipeline_mode = #tpu.pipeline_mode<synchronous>, transform_indices = @transform_1, window_bounds = array<i64: 128, 8>}, {pipeline_mode = #tpu.pipeline_mode<synchronous>, transform_indices = @transform_2, window_bounds = array<i64: 8, 128>}, {transform_indices = @transform_3, window_bounds = array<i64: 2, 128, 64>}]} {
    %c0 = arith.constant 0 : index
    %c0_0 = arith.constant 0 : index
    %c0_1 = arith.constant 0 : index
    %0 = vector.load %arg1[%c0, %c0_0, %c0_1] : memref<2x128x64xf32, #tpu.memory_space<vmem>>, vector<2x128x64xf32>
    %cst = arith.constant dense<0.000000e+00> : vector<2x128xf32>
    %1 = vector.multi_reduction <add>, %0, %cst [2] : vector<2x128x64xf32> to vector<2x128xf32>
    %cst_2 = arith.constant 6.400000e+01 : f32
    %2 = vector.broadcast %cst_2 : f32 to vector<2x128xf32>
    %3 = arith.divf %1, %2 : vector<2x128xf32>
    %c0_3 = arith.constant 0 : index
    %c0_4 = arith.constant 0 : index
    %4 = vector.load %arg2[%c0_3, %c0_4] : memref<128x8xf32, #tpu.memory_space<vmem>>, vector<128x8xf32>
    %cst_5 = arith.constant dense<0.000000e+00> : vector<2x8xf32>
    %5 = tpu.matmul %3, %4, %cst_5 {dimension_numbers = #tpu.dot_dimension_numbers<[1], [0], [0], [1], [0, 0, 1, 1], [], []>} : vector<2x128xf32>, vector<128x8xf32>, vector<2x8xf32> -> vector<2x8xf32>
    %cst_6 = arith.constant 0.000000e+00 : f32
    %6 = vector.broadcast %cst_6 : f32 to vector<2x8xf32>
    %7 = arith.maximumf %5, %6 : vector<2x8xf32>
    %c0_7 = arith.constant 0 : index
    %c0_8 = arith.constant 0 : index
    %8 = vector.load %arg3[%c0_7, %c0_8] : memref<8x128xf32, #tpu.memory_space<vmem>>, vector<8x128xf32>
    %cst_9 = arith.constant dense<0.000000e+00> : vector<2x128xf32>
    %9 = tpu.matmul %7, %8, %cst_9 {dimension_numbers = #tpu.dot_dimension_numbers<[1], [0], [0], [1], [0, 0, 1, 1], [], []>} : vector<2x8xf32>, vector<8x128xf32>, vector<2x128xf32> -> vector<2x128xf32>
    %10 = arith.negf %9 : vector<2x128xf32>
    %11 = math.exp %10 : vector<2x128xf32>
    %cst_10 = arith.constant 1.000000e+00 : f32
    %12 = vector.broadcast %cst_10 : f32 to vector<2x128xf32>
    %13 = arith.addf %12, %11 : vector<2x128xf32>
    %14 = arith.divf %12, %13 : vector<2x128xf32>
    %15 = vector.shape_cast %14 : vector<2x128xf32> to vector<2x128x1xf32>
    %16 = vector.broadcast %15 : vector<2x128x1xf32> to vector<2x128x64xf32>
    %17 = arith.mulf %0, %16 : vector<2x128x64xf32>
    %c0_11 = arith.constant 0 : index
    %c0_12 = arith.constant 0 : index
    %c0_13 = arith.constant 0 : index
    %18 = vector.load %arg4[%c0_11, %c0_12, %c0_13] : memref<2x128x64xf32, #tpu.memory_space<vmem>>, vector<2x128x64xf32>
    tpu.vector_store %arg4[%c0_11, %c0_12, %c0_13], %17 {strides = array<i32>} : memref<2x128x64xf32, #tpu.memory_space<vmem>>, vector<2x128x64xf32>,
    return
  }
  func.func @transform_0(%arg0: i32) -> (i32, i32, i32) {
    %c0_i32 = arith.constant 0 : i32
    %c0_i32_0 = arith.constant 0 : i32
    %c0_i32_1 = arith.constant 0 : i32
    return %arg0, %c0_i32, %c0_i32_0 : i32, i32, i32
  }
  func.func @transform_1(%arg0: i32) -> (i32, i32) {
    %c0_i32 = arith.constant 0 : i32
    %c0_i32_0 = arith.constant 0 : i32
    %c0_i32_1 = arith.constant 0 : i32
    return %c0_i32, %c0_i32_0 : i32, i32
  }
  func.func @transform_2(%arg0: i32) -> (i32, i32) {
    %c0_i32 = arith.constant 0 : i32
    %c0_i32_0 = arith.constant 0 : i32
    %c0_i32_1 = arith.constant 0 : i32
    return %c0_i32, %c0_i32_0 : i32, i32
  }
  func.func @transform_3(%arg0: i32) -> (i32, i32, i32) {
    %c0_i32 = arith.constant 0 : i32
    %c0_i32_0 = arith.constant 0 : i32
    %c0_i32_1 = arith.constant 0 : i32
    return %arg0, %c0_i32, %c0_i32_0 : i32, i32, i32
  }
}

</mosaic_0001>

<bundles_post_ra>
// kernel: tpu_custom_call.1
= control target key start
LH: loop header
LB: loop body
LE: loop exit
PB: predicated region body
PF: predicated region fallthrough
CT: control target
= control target key end

     0   :  { %s1136_s12 = smov 0   ;;  %s1595_s0 = inlined_call_operand.vmem [shape: f32[8,128,64], index: 0, kind: input, shape index: {}]   ;;  %s1596_s1 = inlined_call_operand.vmem [shape: f32[128,8], index: 1, kind: input, shape index: {}]   ;;  %s1597_s2 = inlined_call_operand.vmem [shape: f32[8,128], index: 2, kind: input, shape index: {}]   ;;  %s1598_s3 = inlined_call_operand.vmem [shape: f32[8,128,64], index: 3, kind: output, shape index: {}]  }
   0x1 LB: > { %s990_s13 = sadd.s32 4294967295, %s1111_s12   ;;  %p994_p0 = scmp.ge.s32.totalorder %s1111_s12, 1  ;;  %s1111_s12 = sphi %s1136_s12, %s13_s12  }
   0x2   : > { %p139_p1 = scmp.lt.s32.totalorder %s1111_s12, 5 }
   0x4   : > { %p140_p2 = pnand %p994_p0, %p139_p1 }
   0x6   : > { %143 = sbr.rel (%p140_p2) target bundleno = 866 (0x362), region = 32 }
   0xd   : > { %s995_s14 = sshll.u32 %s990_s13, 1  ;;  %vm211_vm0 = vcmask 523264   ;;  %v341_v54 = vld [vmem:[%s1596_s1] sm:$0xff]  ;;  %v342_v55 = vld [vmem:[%s1596_s1 + $0x8] sm:$0xff]  ;;  %v1113_v60 = vmov 0.0|0.0   ;;  %v343_v62 = vld [vmem:[%s1596_s1 + $0x10] sm:$0xff] }
   0xe   : > { %p166_p3 = scmp.lt.s32.totalorder %s995_s14, 7  ;;  %v1067_v56 = vpack.c.bf16 %v342_v55, %v341_v54  ;;  %1066 = vmatprep.subr.bf16.mxu0 %v1113_v60  ;;  %v344_v63 = vld [vmem:[%s1596_s1 + $0x18] sm:$0xff]  ;;  %vm1114_vm1 = vmmov 0   ;;  %vm400_vm2 = vcmask 130112   ;;  %vm407_vm3 = vcmask 195712  }
   0xf   : > { %vm414_vm4 = vcmask 261312   ;;  %vm421_vm5 = vcmask 326912   ;;  %vm428_vm6 = vcmask 392512   ;;  %vm435_vm7 = vcmask 458112  }
  0x10   : > { %s1666_s14 = smov (!%p166_p3, %s995_s14), 7  ;;  %1068 = vmatpush3.bf16.msra.mxu0 %v1067_v56  ;;  %vm442_vm8 = vcmask 523712   ;;  %vm449_vm9 = vcmask 589312   ;;  %vm456_vm10 = vcmask 654912   ;;  %vm463_vm11 = vcmask 720512  }
  0x11   : > { %s1005_s15 = sshll.u32 %s1666_s14, 7  ;;  %1069 = vmatprep.subr.bf16.mxu0 %v1113_v60  ;;  %vm470_vm12 = vcmask 786112   ;;  %vm477_vm13 = vcmask 851712   ;;  %vm484_vm14 = vcmask 917312   ;;  %vm491_vm15 = vcmask 982912  }
  0x12   : > { %s1152_s18 = scalar_lea.vmem %s1595_s0, %s1005_s15  ;;  %s1494_s4 = scalar_lea.vmem %s1598_s3, %s1005_s15 }
  0x13   : > { %v1155_v0 = vld [vmem:[%s1152_s18 + $0x80] sm:$0xff]  ;;  %v1161_v2 = vld [vmem:[%s1152_s18 + $0x88] sm:$0xff]  ;;  %v1175_v8 = vld [vmem:[%s1152_s18 + $0x90] sm:$0xff] }
  0x14   : > { %1621 = vst [vmem:[#allocation2_spill] sm:$0xff] %v1155_v0  ;;  %v1158_v1 = vld [vmem:[%s1152_s18] sm:$0xff]  ;;  %1622 = vst [vmem:[#allocation3_spill] sm:$0xff] %v1161_v2  ;;  %v260_v3 = vsel %vm211_vm0, %v1155_v0, 0.0  ;;  %v1168_v5 = vld [vmem:[%s1152_s18 + $0x8] sm:$0xff]  ;;  %v263_v6 = vsel %vm211_vm0, %v1161_v2, 0.0 }
  0x15   : > { %v212_v4 = vsel %vm211_vm0, %v1158_v1, 0.0  ;;  %261 = vadd.xlane.f32.xlu1 %v260_v3  ;;  %v215_v7 = vsel %vm211_vm0, %v1168_v5, 0.0  ;;  %1623 = vst [vmem:[#allocation4_spill] sm:$0xff] %v1175_v8  ;;  %v1178_v9 = vld [vmem:[%s1152_s18 + $0x10] sm:$0xff]  ;;  %v266_v10 = vsel %vm211_vm0, %v1175_v8, 0.0  ;;  %v1185_v12 = vld [vmem:[%s1152_s18 + $0x98] sm:$0xff]  ;;  %v1070_v3 = vpack.c.bf16 %v344_v63, %v343_v62 }
  0x16   : > { %213 = vadd.xlane.f32.xlu0 %v212_v4  ;;  %v218_v11 = vsel %vm211_vm0, %v1178_v9, 0.0  ;;  %1624 = vst [vmem:[#allocation5_spill] sm:$0xff] %v1185_v12  ;;  %v1188_v13 = vld [vmem:[%s1152_s18 + $0x18] sm:$0xff]  ;;  %v269_v14 = vsel %vm211_vm0, %v1185_v12, 0.0  ;;  %v1195_v16 = vld [vmem:[%s1152_s18 + $0xa0] sm:$0xff]  ;;  %v1205_v20 = vld [vmem:[%s1152_s18 + $0xa8] sm:$0xff] }
  0x17   : > { %v221_v15 = vsel %vm211_vm0, %v1188_v13, 0.0  ;;  %1625 = vst [vmem:[#allocation6_spill] sm:$0xff] %v1195_v16  ;;  %v1198_v17 = vld [vmem:[%s1152_s18 + $0x20] sm:$0xff]  ;;  %v272_v18 = vsel %vm211_vm0, %v1195_v16, 0.0  ;;  %1626 = vst [vmem:[#allocation7_spill] sm:$0xff] %v1205_v20  ;;  %v1208_v21 = vld [vmem:[%s1152_s18 + $0x28] sm:$0xff]  ;;  %1071 = vmatpush3.bf16.msra.mxu0 %v1070_v3 }
  0x18   : > { %v224_v19 = vsel %vm211_vm0, %v1198_v17, 0.0  ;;  %v275_v22 = vsel %vm211_vm0, %v1205_v20, 0.0  ;;  %v227_v23 = vsel %vm211_vm0, %v1208_v21, 0.0  ;;  %v1215_v24 = vld [vmem:[%s1152_s18 + $0xb0] sm:$0xff]  ;;  %v1225_v28 = vld [vmem:[%s1152_s18 + $0xb8] sm:$0xff]  ;;  %v1235_v32 = vld [vmem:[%s1152_s18 + $0xc0] sm:$0xff]  ;;  %1072 = vmatprep.subr.bf16.mxu0 %v1113_v60 }
  0x19   : > { %264 = vadd.xlane.f32.xlu1 %v263_v6  ;;  %1627 = vst [vmem:[#allocation8_spill] sm:$0xff] %v1215_v24  ;;  %v1218_v25 = vld [vmem:[%s1152_s18 + $0x30] sm:$0xff]  ;;  %v278_v26 = vsel %vm211_vm0, %v1215_v24, 0.0  ;;  %1628 = vst [vmem:[#allocation9_spill] sm:$0xff] %v1225_v28  ;;  %v1228_v29 = vld [vmem:[%s1152_s18 + $0x38] sm:$0xff]  ;;  %v281_v30 = vsel %vm211_vm0, %v1225_v28, 0.0 }
  0x1a   : > { %216 = vadd.xlane.f32.xlu0 %v215_v7  ;;  %v230_v27 = vsel %vm211_vm0, %v1218_v25, 0.0  ;;  %v233_v31 = vsel %vm211_vm0, %v1228_v29, 0.0  ;;  %1629 = vst [vmem:[#allocation10_spill] sm:$0xff] %v1235_v32  ;;  %v1238_v33 = vld [vmem:[%s1152_s18 + $0x40] sm:$0xff]  ;;  %v284_v34 = vsel %vm211_vm0, %v1235_v32, 0.0  ;;  %v1245_v36 = vld [vmem:[%s1152_s18 + $0xc8] sm:$0xff] }
  0x1b   : > { %v236_v35 = vsel %vm211_vm0, %v1238_v33, 0.0  ;;  %1630 = vst [vmem:[#allocation11_spill] sm:$0xff] %v1245_v36  ;;  %v1248_v37 = vld [vmem:[%s1152_s18 + $0x48] sm:$0xff]  ;;  %v287_v38 = vsel %vm211_vm0, %v1245_v36, 0.0  ;;  %v1255_v40 = vld [vmem:[%s1152_s18 + $0xd0] sm:$0xff]  ;;  %v1265_v44 = vld [vmem:[%s1152_s18 + $0xd8] sm:$0xff] }
  0x1c   : > { %1631 = vst [vmem:[#allocation12_spill] sm:$0xff] %v1248_v37  ;;  %v239_v39 = vsel %vm211_vm0, %v1248_v37, 0.0  ;;  %1632 = vst [vmem:[#allocation13_spill] sm:$0xff] %v1255_v40  ;;  %v1258_v41 = vld [vmem:[%s1152_s18 + $0x50] sm:$0xff]  ;;  %v290_v42 = vsel %vm211_vm0, %v1255_v40, 0.0  ;;  %v1268_v45 = vld [vmem:[%s1152_s18 + $0x58] sm:$0xff] }
  0x1d   : > { %267 = vadd.xlane.f32.xlu1 %v266_v10  ;;  %v242_v43 = vsel %vm211_vm0, %v1258_v41, 0.0  ;;  %1633 = vst [vmem:[#allocation14_spill] sm:$0xff] %v1265_v44  ;;  %1634 = vst [vmem:[#allocation15_spill] sm:$0xff] %v1268_v45  ;;  %v293_v46 = vsel %vm211_vm0, %v1265_v44, 0.0  ;;  %v245_v47 = vsel %vm211_vm0, %v1268_v45, 0.0  ;;  %v1275_v48 = vld [vmem:[%s1152_s18 + $0xe0] sm:$0xff] }
  0x1e   : > { %219 = vadd.xlane.f32.xlu0 %v218_v11  ;;  %1635 = vst [vmem:[#allocation16_spill] sm:$0xff] %v1275_v48  ;;  %v1278_v49 = vld [vmem:[%s1152_s18 + $0x60] sm:$0xff]  ;;  %v296_v50 = vsel %vm211_vm0, %v1275_v48, 0.0  ;;  %v1285_v52 = vld [vmem:[%s1152_s18 + $0xe8] sm:$0xff]  ;;  %v1301_v59 = vld [vmem:[%s1152_s18 + $0xf0] sm:$0xff] }
  0x1f   : > { %1636 = vst [vmem:[#allocation17_spill] sm:$0xff] %v1278_v49  ;;  %v248_v51 = vsel %vm211_vm0, %v1278_v49, 0.0  ;;  %1637 = vst [vmem:[#allocation18_spill] sm:$0xff] %v1285_v52  ;;  %v1288_v53 = vld [vmem:[%s1152_s18 + $0x68] sm:$0xff]  ;;  %v299_v57 = vsel %vm211_vm0, %v1285_v52, 0.0  ;;  %v1304_v61 = vld [vmem:[%s1152_s18 + $0x70] sm:$0xff] }
  0x20   : > { %1638 = vst [vmem:[#allocation19_spill] sm:$0xff] %v1288_v53  ;;  %v251_v58 = vsel %vm211_vm0, %v1288_v53, 0.0  ;;  %1639 = vst [vmem:[#allocation20_spill] sm:$0xff] %v1301_v59  ;;  %v302_v4 = vsel %vm211_vm0, %v1301_v59, 0.0  ;;  %v254_v6 = vsel %vm211_vm0, %v1304_v61, 0.0  ;;  %v1317_v7 = vld [vmem:[%s1152_s18 + $0xf8] sm:$0xff] }
  0x21   : > { %270 = vadd.xlane.f32.xlu1 %v269_v14  ;;  %1640 = vst [vmem:[#allocation21_spill] sm:$0xff] %v1304_v61  ;;  %1641 = vst [vmem:[#allocation22_spill] sm:$0xff] %v1317_v7  ;;  %v1320_v10 = vld [vmem:[%s1152_s18 + $0x78] sm:$0xff]  ;;  %v345_v11 = vld [vmem:[%s1596_s1 + $0x20] sm:$0xff] }
  0x22   : > { %222 = vadd.xlane.f32.xlu0 %v221_v15  ;;  %1642 = vst [vmem:[#allocation23_spill] sm:$0xff] %v1320_v10  ;;  %v346_v14 = vld [vmem:[%s1596_s1 + $0x28] sm:$0xff] }
  0x23   : > { %v1073_v15 = vpack.c.bf16 %v346_v14, %v345_v11 }
  0x25   : > { %273 = vadd.xlane.f32.xlu1 %v272_v18  ;;  %v305_v18 = vsel %vm211_vm0, %v1317_v7, 0.0  ;;  %1074 = vmatpush3.bf16.msra.mxu0 %v1073_v15 }
  0x26   : > { %225 = vadd.xlane.f32.xlu0 %v224_v19  ;;  %v257_v19 = vsel %vm211_vm0, %v1320_v10, 0.0  ;;  %1075 = vmatprep.subr.bf16.mxu0 %v1113_v60 }
  0x29   : > { %276 = vadd.xlane.f32.xlu1 %v275_v22  ;;  %v347_v22 = vld [vmem:[%s1596_s1 + $0x30] sm:$0xff] }
  0x2a   : > { %228 = vadd.xlane.f32.xlu0 %v227_v23  ;;  %v348_v23 = vld [vmem:[%s1596_s1 + $0x38] sm:$0xff] }
  0x2d   : > { %279 = vadd.xlane.f32.xlu1 %v278_v26  ;;  %v1076_v26 = vpack.c.bf16 %v348_v23, %v347_v22 }
  0x2e   : > { %231 = vadd.xlane.f32.xlu0 %v230_v27  ;;  %v349_v27 = vld [vmem:[%s1596_s1 + $0x40] sm:$0xff] }
  0x2f   : > { %1077 = vmatpush3.bf16.msra.mxu0 %v1076_v26 }
  0x30   : > { %1078 = vmatprep.subr.bf16.mxu0 %v1113_v60 }
  0x31   : > { %282 = vadd.xlane.f32.xlu1 %v281_v30  ;;  %v350_v30 = vld [vmem:[%s1596_s1 + $0x48] sm:$0xff] }
  0x32   : > { %234 = vadd.xlane.f32.xlu0 %v233_v31  ;;  %v1079_v31 = vpack.c.bf16 %v350_v30, %v349_v27 }
  0x34   : > { %1080 = vmatpush3.bf16.msra.mxu0 %v1079_v31 }
  0x35   : > { %285 = vadd.xlane.f32.xlu1 %v284_v34  ;;  %v351_v34 = vld [vmem:[%s1596_s1 + $0x50] sm:$0xff]  ;;  %1081 = vmatprep.subr.bf16.mxu0 %v1113_v60 }
  0x36   : > { %237 = vadd.xlane.f32.xlu0 %v236_v35  ;;  %v352_v35 = vld [vmem:[%s1596_s1 + $0x58] sm:$0xff] }
  0x39   : > { %288 = vadd.xlane.f32.xlu1 %v287_v38  ;;  %v1082_v38 = vpack.c.bf16 %v352_v35, %v351_v34 }
  0x3a   : > { %240 = vadd.xlane.f32.xlu0 %v239_v39  ;;  %v353_v39 = vld [vmem:[%s1596_s1 + $0x60] sm:$0xff] }
  0x3b   : > { %1083 = vmatpush3.bf16.msra.mxu0 %v1082_v38 }
  0x3c   : > { %1084 = vmatprep.subr.bf16.mxu0 %v1113_v60 }
  0x3d   : > { %291 = vadd.xlane.f32.xlu1 %v290_v42  ;;  %v354_v42 = vld [vmem:[%s1596_s1 + $0x68] sm:$0xff] }
  0x3e   : > { %243 = vadd.xlane.f32.xlu0 %v242_v43  ;;  %v1085_v43 = vpack.c.bf16 %v354_v42, %v353_v39 }
  0x40   : > { %1086 = vmatpush3.bf16.msra.mxu0 %v1085_v43 }
  0x41   : > { %294 = vadd.xlane.f32.xlu1 %v293_v46  ;;  %v355_v46 = vld [vmem:[%s1596_s1 + $0x70] sm:$0xff]  ;;  %1087 = vmatprep.subr.bf16.mxu0 %v1113_v60 }
  0x42   : > { %246 = vadd.xlane.f32.xlu0 %v245_v47  ;;  %v356_v47 = vld [vmem:[%s1596_s1 + $0x78] sm:$0xff] }
  0x45   : > { %297 = vadd.xlane.f32.xlu1 %v296_v50  ;;  %v1088_v50 = vpack.c.bf16 %v356_v47, %v355_v46 }
  0x46   : > { %249 = vadd.xlane.f32.xlu0 %v248_v51  ;;  %v1115_v51 = vmov 0.0  }
  0x47   : > { %1058 = vmatprep.mubr.msk.f32.mxu0 %vm1114_vm1, %v1115_v51  ;;  %1061 = vmatprep.subr.mxu1 %v1115_v51 }
  0x48   : > { %1089 = vmatpush3.bf16.msra.mxu0 %v1088_v50  ;;  %1063 = vmatprep.mubr.msk.f32.mxu1 %vm1114_vm1, %v1115_v51  ;;  %vm498_vm1 = vcmask 1048512  }
  0x49   : > { %300 = vadd.xlane.f32.xlu1 %v299_v57 }
  0x4a   : > { %252 = vadd.xlane.f32.xlu0 %v251_v58 }
  0x4d   : > { %303 = vadd.xlane.f32.xlu1 %v302_v4 }
  0x4e   : > { %255 = vadd.xlane.f32.xlu0 %v254_v6 }
  0x51   : > { %306 = vadd.xlane.f32.xlu1 %v305_v18  ;;  %v389_v18 = vlaneseq }
  0x52   : > { %258 = vadd.xlane.f32.xlu0 %v257_v19 }
  0x53   : > { %v390_v23 = vand.u32 127, %v389_v18  ;;  %v1370_v26 = vshrl.u32 %v389_v18, 7 }
  0x55   : > { %v395_v27 = vadd.s32 4294967288, %v390_v23  ;;  %v402_v30 = vadd.s32 4294967280, %v390_v23  ;;  %v409_v31 = vadd.s32 4294967272, %v390_v23  ;;  %v416_v38 = vadd.s32 4294967264, %v390_v23 }
  0x56   : > { %v423_v39 = vadd.s32 4294967256, %v390_v23  ;;  %v430_v42 = vadd.s32 4294967248, %v390_v23  ;;  %v437_v43 = vadd.s32 4294967240, %v390_v23  ;;  %v444_v46 = vadd.s32 4294967232, %v390_v23 }
  0x57   : > { %v451_v47 = vadd.s32 4294967224, %v390_v23  ;;  %v393_v50 = vsub.s32 %v390_v23, %v1370_v26  ;;  %v458_v51 = vadd.s32 4294967216, %v390_v23  ;;  %v465_v7 = vadd.s32 4294967208, %v390_v23 }
  0x58   : > { %v398_v18 = vsub.s32 %v395_v27, %v1370_v26  ;;  %v405_v52 = vsub.s32 %v402_v30, %v1370_v26  ;;  %v1380_v59 = vsub.s32 %v409_v31, %v1370_v26  ;;  %v1387_v36 = vsub.s32 %v416_v38, %v1370_v26 }
  0x59   : > { %v1390_v40 = vsub.s32 %v423_v39, %v1370_v26  ;;  %v472_v28 = vadd.s32 4294967200, %v390_v23  ;;  %v479_v32 = vadd.s32 4294967192, %v390_v23  ;;  %v1393_v27 = vsub.s32 %v430_v42, %v1370_v26 }
  0x5a   : > { %v1396_v30 = vsub.s32 %v437_v43, %v1370_v26  ;;  %v1399_v31 = vsub.s32 %v444_v46, %v1370_v26  ;;  %v1402_v20 = vsub.s32 %v451_v47, %v1370_v26  ;;  %v1405_v39 = vsub.s32 %v458_v51, %v1370_v26 }
  0x5b   : > { %v1408_v12 = vsub.s32 %v465_v7, %v1370_v26  ;;  %v1411_v47 = vsub.s32 %v472_v28, %v1370_v26  ;;  %v486_v7 = vadd.s32 4294967184, %v390_v23  ;;  %v493_v53 = vadd.s32 4294967176, %v390_v23 }
  0xa2   : > { %v262_v54 = vpop.xlane.xlu1 %261 }
  0xa3   : > { %v214_v55 = vpop.xlane.xlu0 %213  ;;  %v325_v42 = vmul.f32 0.015625, %v262_v54 }
  0xa4   : > { %v309_v16 = vmul.f32 0.015625, %v214_v55 }
  0xa5   : > { %v503_v61 = vrot.slane %v325_v42, %v393_v50 }
  0xa6   : > { %v265_v56 = vpop.xlane.xlu1 %264  ;;  %v394_v45 = vrot.slane %v309_v16, %v393_v50 }
  0xa7   : > { %v217_v57 = vpop.xlane.xlu0 %216  ;;  %v326_v38 = vmul.f32 0.015625, %v265_v56  ;;  %v1414_v56 = vsub.s32 %v479_v32, %v1370_v26 }
  0xa8   : > { %v310_v24 = vmul.f32 0.015625, %v217_v57 }
  0xa9   : > { %v507_v54 = vrot.slane %v326_v38, %v398_v18 }
  0xaa   : > { %v268_v58 = vpop.xlane.xlu1 %267  ;;  %v399_v55 = vrot.slane %v310_v24, %v398_v18 }
  0xab   : > { %v220_v62 = vpop.xlane.xlu0 %219  ;;  %v327_v2 = vmul.f32 0.015625, %v268_v58  ;;  %v508_v16 = vsel %vm400_vm2, %v507_v54, %v503_v61 }
  0xac   : > { %v311_v43 = vmul.f32 0.015625, %v220_v62 }
  0xad   : > { %v512_v49 = vrot.slane %v327_v2, %v405_v52  ;;  %v1426_v2 = vsub.s32 %v493_v53, %v1370_v26 }
  0xae   : > { %v271_v63 = vpop.xlane.xlu1 %270 }
  0xaf   : > { %v223_v3 = vpop.xlane.xlu0 %222  ;;  %v328_v10 = vmul.f32 0.015625, %v271_v63  ;;  %v406_v63 = vrot.slane %v311_v43, %v405_v52  ;;  %v401_v52 = vsel %vm400_vm2, %v399_v55, %v394_v45  ;;  %vm579_vm2 = vcmask 1041409  }
  0xb0   : > { %v312_v0 = vmul.f32 0.015625, %v223_v3 }
  0xb1   : > { %v517_v28 = vrot.slane %v328_v10, %v1380_v59  ;;  %v513_v10 = vsel %vm407_vm3, %v512_v49, %v508_v16 }
  0xb2   : > { %v274_v4 = vpop.xlane.xlu1 %273  ;;  %v413_v32 = vrot.slane %v312_v0, %v1380_v59 }
  0xb3   : > { %v226_v6 = vpop.xlane.xlu0 %225  ;;  %v329_v57 = vmul.f32 0.015625, %v274_v4  ;;  %v518_v61 = vsel %vm414_vm4, %v517_v28, %v513_v10 }
  0xb4   : > { %v313_v51 = vmul.f32 0.015625, %v226_v6 }
  0xb5   : > { %v522_v23 = vrot.slane %v329_v57, %v1387_v36 }
  0xb6   : > { %v277_v11 = vpop.xlane.xlu1 %276  ;;  %v420_v24 = vrot.slane %v313_v51, %v1387_v36 }
  0xb7   : > { %v229_v14 = vpop.xlane.xlu0 %228  ;;  %v330_v58 = vmul.f32 0.015625, %v277_v11  ;;  %v1423_v11 = vsub.s32 %v486_v7, %v1370_v26  ;;  %v523_v49 = vsel %vm421_vm5, %v522_v23, %v518_v61 }
  0xb8   : > { %v314_v62 = vmul.f32 0.015625, %v229_v14  ;;  %v408_v14 = vsel %vm407_vm3, %v406_v63, %v401_v52  ;;  %vm654_vm3 = vcmask 64512  }
  0xb9   : > { %v527_v0 = vrot.slane %v330_v58, %v1390_v40  ;;  %v415_v45 = vsel %vm414_vm4, %v413_v32, %v408_v14 }
  0xba   : > { %v1362_v60 = vpop.xlane.xlu1 %279  ;;  %v427_v59 = vrot.slane %v314_v62, %v1390_v40  ;;  %v422_v18 = vsel %vm421_vm5, %v420_v24, %v415_v45 }
  0xbb   : > { %v1364_v15 = vpop.xlane.xlu0 %231  ;;  %v331_v4 = vmul.f32 0.015625, %v1362_v60  ;;  %v528_v38 = vsel %vm428_vm6, %v527_v0, %v523_v49 }
  0xbc   : > { %v315_v6 = vmul.f32 0.015625, %v1364_v15  ;;  %v429_v42 = vsel %vm428_vm6, %v427_v59, %v422_v18 }
  0xbd   : > { %v532_v50 = vrot.slane %v331_v4, %v1393_v27 }
  0xbe   : > { %v1366_v19 = vpop.xlane.xlu1 %282  ;;  %v434_v40 = vrot.slane %v315_v6, %v1393_v27 }
  0xbf   : > { %v1368_v22 = vpop.xlane.xlu0 %234  ;;  %v332_v36 = vmul.f32 0.015625, %v1366_v19 }
  0xc0   : > { %v316_v60 = vmul.f32 0.015625, %v1368_v22  ;;  %v436_v58 = vsel %vm435_vm7, %v434_v40, %v429_v42 }
  0xc1   : > { %v537_v27 = vrot.slane %v332_v36, %v1396_v30 }
  0xc2   : > { %v1372_v34 = vpop.xlane.xlu1 %285  ;;  %v441_v51 = vrot.slane %v316_v60, %v1396_v30 }
  0xc3   : > { %v1374_v35 = vpop.xlane.xlu0 %237  ;;  %v333_v19 = vmul.f32 0.015625, %v1372_v34 }
  0xc4   : > { %v317_v22 = vmul.f32 0.015625, %v1374_v35  ;;  %v533_v35 = vsel %vm435_vm7, %v532_v50, %v528_v38  ;;  %v443_v23 = vsel %vm442_vm8, %v441_v51, %v436_v58 }
  0xc5   : > { %v538_v6 = vsel %vm442_vm8, %v537_v27, %v533_v35 }
  0xc6   : > { %v1382_v44 = vpop.xlane.xlu1 %288 }
  0xc7   : > { %v1384_v48 = vpop.xlane.xlu0 %240  ;;  %v334_v43 = vmul.f32 0.015625, %v1382_v44  ;;  %v542_v44 = vrot.slane %v333_v19, %v1399_v31 }
  0xc8   : > { %v318_v57 = vmul.f32 0.015625, %v1384_v48  ;;  %v448_v48 = vrot.slane %v317_v22, %v1399_v31 }
  0xc9   : > { %v547_v30 = vrot.slane %v334_v43, %v1402_v20 }
  0xca   : > { %v292_v8 = vpop.xlane.xlu1 %291  ;;  %v450_v10 = vsel %vm449_vm9, %v448_v48, %v443_v23 }
  0xcb   : > { %v244_v46 = vpop.xlane.xlu0 %243  ;;  %v335_v7 = vmul.f32 0.015625, %v292_v8  ;;  %v455_v8 = vrot.slane %v318_v57, %v1402_v20  ;;  %v543_v20 = vsel %vm449_vm9, %v542_v44, %v538_v6 }
  0xcc   : > { %v319_v54 = vmul.f32 0.015625, %v244_v46  ;;  %v548_v60 = vsel %vm456_vm10, %v547_v30, %v543_v20 }
  0xce   : > { %v295_v3 = vpop.xlane.xlu1 %294 }
  0xcf   : > { %v247_v37 = vpop.xlane.xlu0 %246  ;;  %v336_v62 = vmul.f32 0.015625, %v295_v3  ;;  %v552_v3 = vrot.slane %v335_v7, %v1405_v39 }
  0xd0   : > { %v320_v63 = vmul.f32 0.015625, %v247_v37  ;;  %v462_v37 = vrot.slane %v319_v54, %v1405_v39  ;;  %v457_v39 = vsel %vm456_vm10, %v455_v8, %v450_v10 }
  0xd1   : > { %v557_v31 = vrot.slane %v336_v62, %v1408_v12 }
  0xd2   : > { %v298_v53 = vpop.xlane.xlu1 %297  ;;  %v469_v52 = vrot.slane %v320_v63, %v1408_v12  ;;  %v553_v12 = vsel %vm463_vm11, %v552_v3, %v548_v60  ;;  %v464_v61 = vsel %vm463_vm11, %v462_v37, %v457_v39  ;;  %v1644_v39 = vld [vmem:[#allocation17_spill] sm:$0xff] }
  0xd3   : > { %v250_v15 = vpop.xlane.xlu0 %249  ;;  %v337_v28 = vmul.f32 0.015625, %v298_v53 }
  0xd4   : > { %v321_v32 = vmul.f32 0.015625, %v250_v15  ;;  %v471_v18 = vsel %vm470_vm12, %v469_v52, %v464_v61  ;;  %v1646_v61 = vld [vmem:[#allocation21_spill] sm:$0xff] }
  0xd5   : > { %v562_v14 = vrot.slane %v337_v28, %v1411_v47 }
  0xd6   : > { %v301_v34 = vpop.xlane.xlu1 %300  ;;  %v476_v36 = vrot.slane %v321_v32, %v1411_v47  ;;  %v558_v47 = vsel %vm470_vm12, %v557_v31, %v553_v12  ;;  %v736_v32 = vsub.s32 0, %v1370_v26 }
  0xd7   : > { %v253_v55 = vpop.xlane.xlu0 %252  ;;  %v338_v46 = vmul.f32 0.015625, %v301_v34  ;;  %v563_v38 = vsel %vm477_vm13, %v562_v14, %v558_v47 }
  0xd8   : > { %v322_v4 = vmul.f32 0.015625, %v253_v55  ;;  %v653_v55 = vld [vmem:[%s1597_s2] sm:$0xff] }
  0xd9   : > { %v567_v53 = vrot.slane %v338_v46, %v1414_v56  ;;  %1062 = vmatpush3.msra.mxu1 %v653_v55  ;;  %v803_v46 = vsub.s32 1, %v1370_v26 }
  0xda   : > { %v304_v24 = vpop.xlane.xlu1 %303  ;;  %v483_v15 = vrot.slane %v322_v4, %v1414_v56  ;;  %v478_v56 = vsel %vm477_vm13, %v476_v36, %v471_v18  ;;  %v1648_v18 = vld [vmem:[#allocation2_spill] sm:$0xff] }
  0xdb   : > { %v256_v16 = vpop.xlane.xlu0 %255  ;;  %v339_v0 = vmul.f32 0.015625, %v304_v24  ;;  %v568_v42 = vsel %vm484_vm14, %v567_v53, %v563_v38 }
  0xdc   : > { %v323_v59 = vmul.f32 0.015625, %v256_v16  ;;  %v485_v43 = vsel %vm484_vm14, %v483_v15, %v478_v56  ;;  %v1649_v56 = vld [vmem:[#allocation23_spill] sm:$0xff] }
  0xdd   : > { %v572_v45 = vrot.slane %v339_v0, %v1423_v11 }
  0xde   : > { %v490_v50 = vrot.slane %v323_v59, %v1423_v11  ;;  %v307_v40 = vpop.xlane.xlu1 %306 }
  0xdf   : > { %v259_v49 = vpop.xlane.xlu0 %258  ;;  %v340_v19 = vmul.f32 0.015625, %v307_v40  ;;  %v573_v51 = vsel %vm491_vm15, %v572_v45, %v568_v42 }
  0xe0   : > { %v324_v22 = vmul.f32 0.015625, %v259_v49  ;;  %v492_v27 = vsel %vm491_vm15, %v490_v50, %v485_v43  ;;  %v1647_v49 = vld [vmem:[#allocation19_spill] sm:$0xff]  ;;  %v1650_v43 = vld [vmem:[#allocation4_spill] sm:$0xff] }
  0xe1   : > { %v577_v11 = vrot.slane %v340_v19, %v1426_v2 }
  0xe2   : > { %v497_v57 = vrot.slane %v324_v22, %v1426_v2 }
  0xe3   : > { %v578_v54 = vsel %vm498_vm1, %v577_v11, %v573_v51  ;;  %v1651_v51 = vld [vmem:[#allocation3_spill] sm:$0xff] }
  0xe4   : > { %v499_v7 = vsel %vm498_vm1, %v497_v57, %v492_v27 }
  0xe5   : > { %v580_v34 = vsel %vm579_vm2, %v578_v54, %v499_v7  ;;  %v1652_v54 = vld [vmem:[#allocation6_spill] sm:$0xff] }
  0xe6   : > { %1059 = vmatmul.mubr.f32.vlgmr.msra.gmra.mrb[0].mxu0 %v580_v34 }
 0x1b9   : > { %v648_v35 = vpop.f32.mrb[0].mxu0 }
 0x1ba   : > { %v652_v58 = vmax.f32 %v648_v35, 0.0  ;;  %v1060_v62 = vpop.f32.mrb[1].mxu0 }
 0x1bc   : > { %1064 = vmatmul.mubr.msk.f32.vlgmr.msra.gmra.mrb[0].mxu1 %vm654_vm3, %v652_v58  ;;  %v1653_v58 = vld [vmem:[#allocation5_spill] sm:$0xff] }
 0x28f   : > { %v724_v63 = vpop.f32.mrb[0].mxu1 }
 0x290   : > { %v1002_v2 = vmul.f32 -1.442695, %v724_v63  ;;  %v1065_v44 = vpop.f32.mrb[1].mxu1  ;;  %v1654_v63 = vld [vmem:[#allocation8_spill] sm:$0xff] }
 0x292   : > { %1101 = vpow2.f32 %v1002_v2 }
 0x29c   : > { %v1102_v48 = vpop.eup %1101 }
 0x29d   : > { %v731_v28 = vadd.f32 1.0, %v1102_v48 }
 0x29f   : > { %1103 = vrcp.f32 %v731_v28  ;;  %v1655_v28 = vld [vmem:[#allocation7_spill] sm:$0xff] }
 0x2a9   : > { %v1104_v30 = vpop.eup %1103 }
 0x2aa   : > { %v737_v8 = vrot.slane %v1104_v30, %v736_v32  ;;  %v804_v4 = vrot.slane %v1104_v30, %v803_v46  ;;  %v1656_v30 = vld [vmem:[#allocation10_spill] sm:$0xff] }
 0x2ac   : > { %743 = vbcast.lane.b32.xlu1 %v737_v8, 264  ;;  %739 = vbcast.lane.b32.xlu0 %v737_v8, 256 }
 0x2b0   : > { %747 = vbcast.lane.b32.xlu1 %v737_v8, 272  ;;  %755 = vbcast.lane.b32.xlu0 %v737_v8, 288 }
 0x2b4   : > { %751 = vbcast.lane.b32.xlu1 %v737_v8, 280  ;;  %763 = vbcast.lane.b32.xlu0 %v737_v8, 304 }
 0x2b8   : > { %759 = vbcast.lane.b32.xlu1 %v737_v8, 296  ;;  %771 = vbcast.lane.b32.xlu0 %v737_v8, 320 }
 0x2bc   : > { %767 = vbcast.lane.b32.xlu1 %v737_v8, 312  ;;  %779 = vbcast.lane.b32.xlu0 %v737_v8, 336 }
 0x2c0   : > { %775 = vbcast.lane.b32.xlu1 %v737_v8, 328  ;;  %787 = vbcast.lane.b32.xlu0 %v737_v8, 352 }
 0x2c4   : > { %783 = vbcast.lane.b32.xlu1 %v737_v8, 344  ;;  %795 = vbcast.lane.b32.xlu0 %v737_v8, 368 }
 0x2c8   : > { %791 = vbcast.lane.b32.xlu1 %v737_v8, 360  ;;  %806 = vbcast.lane.b32.xlu0 %v804_v4, 256 }
 0x2cc   : > { %799 = vbcast.lane.b32.xlu1 %v737_v8, 376  ;;  %814 = vbcast.lane.b32.xlu0 %v804_v4, 272 }
 0x2d0   : > { %810 = vbcast.lane.b32.xlu1 %v804_v4, 264  ;;  %822 = vbcast.lane.b32.xlu0 %v804_v4, 288 }
 0x2d4   : > { %818 = vbcast.lane.b32.xlu1 %v804_v4, 280  ;;  %830 = vbcast.lane.b32.xlu0 %v804_v4, 304 }
 0x2d8   : > { %826 = vbcast.lane.b32.xlu1 %v804_v4, 296  ;;  %838 = vbcast.lane.b32.xlu0 %v804_v4, 320 }
 0x2dc   : > { %834 = vbcast.lane.b32.xlu1 %v804_v4, 312  ;;  %846 = vbcast.lane.b32.xlu0 %v804_v4, 336 }
 0x2e0   : > { %842 = vbcast.lane.b32.xlu1 %v804_v4, 328  ;;  %854 = vbcast.lane.b32.xlu0 %v804_v4, 352 }
 0x2e4   : > { %850 = vbcast.lane.b32.xlu1 %v804_v4, 344  ;;  %862 = vbcast.lane.b32.xlu0 %v804_v4, 368 }
 0x2e8   : > { %858 = vbcast.lane.b32.xlu1 %v804_v4, 360 }
 0x2ec   : > { %866 = vbcast.lane.b32.xlu1 %v804_v4, 376 }
 0x31e   : > { %v744_v26 = vpop.permute.xlu1 %743  ;;  %v740_v6 = vpop.permute.xlu0 %739 }
 0x31f   : > { %v869_v23 = vmul.f32 %v744_v26, %v1168_v5  ;;  %v868_v3 = vmul.f32 %v740_v6, %v1158_v1  ;;  %v1657_v26 = vld [vmem:[#allocation9_spill] sm:$0xff] }
 0x321   : > { %901 = vst.msk [vmem:[%s1494_s4 + $0x8] sm:$0xff] %vm211_vm0, %v869_v23  ;;  %900 = vst.msk [vmem:[%s1494_s4] sm:$0xff] %vm211_vm0, %v868_v3  ;;  %v1658_v23 = vld [vmem:[#allocation13_spill] sm:$0xff] }
 0x322   : > { %v748_v37 = vpop.permute.xlu1 %747  ;;  %v756_v24 = vpop.permute.xlu0 %755 }
 0x323   : > { %v870_v16 = vmul.f32 %v748_v37, %v1178_v9  ;;  %v872_v31 = vmul.f32 %v756_v24, %v1198_v17 }
 0x325   : > { %902 = vst.msk [vmem:[%s1494_s4 + $0x10] sm:$0xff] %vm211_vm0, %v870_v16  ;;  %904 = vst.msk [vmem:[%s1494_s4 + $0x20] sm:$0xff] %vm211_vm0, %v872_v31  ;;  %v1659_v16 = vld [vmem:[#allocation11_spill] sm:$0xff] }
 0x326   : > { %v752_v52 = vpop.permute.xlu1 %751  ;;  %v764_v5 = vpop.permute.xlu0 %763 }
 0x327   : > { %v871_v1 = vmul.f32 %v752_v52, %v1188_v13  ;;  %v874_v0 = vmul.f32 %v764_v5, %v1218_v25  ;;  %v1660_v52 = vld [vmem:[#allocation16_spill] sm:$0xff] }
 0x329   : > { %903 = vst.msk [vmem:[%s1494_s4 + $0x18] sm:$0xff] %vm211_vm0, %v871_v1  ;;  %906 = vst.msk [vmem:[%s1494_s4 + $0x30] sm:$0xff] %vm211_vm0, %v874_v0 }
 0x32a   : > { %v760_v59 = vpop.permute.xlu1 %759  ;;  %v772_v9 = vpop.permute.xlu0 %771 }
 0x32b   : > { %v873_v17 = vmul.f32 %v760_v59, %v1208_v21  ;;  %v876_v20 = vmul.f32 %v772_v9, %v1238_v33  ;;  %v1643_v33 = vld [vmem:[#allocation12_spill] sm:$0xff]  ;;  %v1661_v59 = vld [vmem:[#allocation14_spill] sm:$0xff] }
 0x32d   : > { %905 = vst.msk [vmem:[%s1494_s4 + $0x28] sm:$0xff] %vm211_vm0, %v873_v17  ;;  %908 = vst.msk [vmem:[%s1494_s4 + $0x40] sm:$0xff] %vm211_vm0, %v876_v20  ;;  %v1662_v17 = vld [vmem:[#allocation20_spill] sm:$0xff] }
 0x32e   : > { %v768_v10 = vpop.permute.xlu1 %767  ;;  %v780_v13 = vpop.permute.xlu0 %779 }
 0x32f   : > { %v875_v25 = vmul.f32 %v768_v10, %v1228_v29  ;;  %v878_v14 = vmul.f32 %v780_v13, %v1258_v41  ;;  %v1645_v41 = vld [vmem:[#allocation15_spill] sm:$0xff]  ;;  %v1663_v13 = vld [vmem:[#allocation18_spill] sm:$0xff] }
 0x331   : > { %907 = vst.msk [vmem:[%s1494_s4 + $0x38] sm:$0xff] %vm211_vm0, %v875_v25  ;;  %910 = vst.msk [vmem:[%s1494_s4 + $0x50] sm:$0xff] %vm211_vm0, %v878_v14 }
 0x332   : > { %v776_v36 = vpop.permute.xlu1 %775  ;;  %v788_v21 = vpop.permute.xlu0 %787 }
 0x333   : > { %v877_v60 = vmul.f32 %v776_v36, %v1643_v33  ;;  %v880_v53 = vmul.f32 %v788_v21, %v1644_v39  ;;  %v1664_v36 = vld [vmem:[#allocation22_spill] sm:$0xff] }
 0x335   : > { %909 = vst.msk [vmem:[%s1494_s4 + $0x48] sm:$0xff] %vm211_vm0, %v877_v60  ;;  %912 = vst.msk [vmem:[%s1494_s4 + $0x60] sm:$0xff] %vm211_vm0, %v880_v53 }
 0x336   : > { %v784_v15 = vpop.permute.xlu1 %783  ;;  %v796_v29 = vpop.permute.xlu0 %795 }
 0x337   : > { %v879_v12 = vmul.f32 %v784_v15, %v1645_v41  ;;  %v882_v45 = vmul.f32 %v796_v29, %v1646_v61 }
 0x339   : > { %911 = vst.msk [vmem:[%s1494_s4 + $0x58] sm:$0xff] %vm211_vm0, %v879_v12  ;;  %914 = vst.msk [vmem:[%s1494_s4 + $0x70] sm:$0xff] %vm211_vm0, %v882_v45 }
 0x33a   : > { %v792_v50 = vpop.permute.xlu1 %791  ;;  %v807_v40 = vpop.permute.xlu0 %806 }
 0x33b   : > { %v881_v47 = vmul.f32 %v792_v50, %v1647_v49  ;;  %v884_v19 = vmul.f32 %v807_v40, %v1648_v18 }
 0x33d   : > { %913 = vst.msk [vmem:[%s1494_s4 + $0x68] sm:$0xff] %vm211_vm0, %v881_v47  ;;  %916 = vst.msk [vmem:[%s1494_s4 + $0x80] sm:$0xff] %vm211_vm0, %v884_v19 }
 0x33e   : > { %v800_v22 = vpop.permute.xlu1 %799  ;;  %v815_v38 = vpop.permute.xlu0 %814 }
 0x33f   : > { %v883_v42 = vmul.f32 %v800_v22, %v1649_v56  ;;  %v886_v11 = vmul.f32 %v815_v38, %v1650_v43 }
 0x341   : > { %915 = vst.msk [vmem:[%s1494_s4 + $0x78] sm:$0xff] %vm211_vm0, %v883_v42  ;;  %918 = vst.msk [vmem:[%s1494_s4 + $0x90] sm:$0xff] %vm211_vm0, %v886_v11 }
 0x342   : > { %v811_v57 = vpop.permute.xlu1 %810  ;;  %v823_v27 = vpop.permute.xlu0 %822 }
 0x343   : > { %v885_v7 = vmul.f32 %v811_v57, %v1651_v51  ;;  %v888_v34 = vmul.f32 %v823_v27, %v1652_v54 }
 0x345   : > { %917 = vst.msk [vmem:[%s1494_s4 + $0x88] sm:$0xff] %vm211_vm0, %v885_v7  ;;  %920 = vst.msk [vmem:[%s1494_s4 + $0xa0] sm:$0xff] %vm211_vm0, %v888_v34 }
 0x346   : > { %v819_v55 = vpop.permute.xlu1 %818  ;;  %v831_v35 = vpop.permute.xlu0 %830 }
 0x347   : > { %v887_v62 = vmul.f32 %v819_v55, %v1653_v58  ;;  %v890_v2 = vmul.f32 %v831_v35, %v1654_v63 }
 0x349   : > { %919 = vst.msk [vmem:[%s1494_s4 + $0x98] sm:$0xff] %vm211_vm0, %v887_v62  ;;  %922 = vst.msk [vmem:[%s1494_s4 + $0xb0] sm:$0xff] %vm211_vm0, %v890_v2 }
 0x34a   : > { %v827_v44 = vpop.permute.xlu1 %826  ;;  %v839_v48 = vpop.permute.xlu0 %838 }
 0x34b   : > { %v889_v32 = vmul.f32 %v827_v44, %v1655_v28  ;;  %v892_v8 = vmul.f32 %v839_v48, %v1656_v30 }
 0x34d   : > { %921 = vst.msk [vmem:[%s1494_s4 + $0xa8] sm:$0xff] %vm211_vm0, %v889_v32  ;;  %924 = vst.msk [vmem:[%s1494_s4 + $0xc0] sm:$0xff] %vm211_vm0, %v892_v8 }
 0x34e   : > { %v835_v46 = vpop.permute.xlu1 %834  ;;  %v847_v4 = vpop.permute.xlu0 %846 }
 0x34f   : > { %v891_v6 = vmul.f32 %v835_v46, %v1657_v26  ;;  %v894_v3 = vmul.f32 %v847_v4, %v1658_v23 }
 0x351   : > { %923 = vst.msk [vmem:[%s1494_s4 + $0xb8] sm:$0xff] %vm211_vm0, %v891_v6  ;;  %926 = vst.msk [vmem:[%s1494_s4 + $0xd0] sm:$0xff] %vm211_vm0, %v894_v3 }
 0x352   : > { %v843_v37 = vpop.permute.xlu1 %842  ;;  %v855_v24 = vpop.permute.xlu0 %854 }
 0x353   : > { %v893_v31 = vmul.f32 %v843_v37, %v1659_v16  ;;  %v896_v5 = vmul.f32 %v855_v24, %v1660_v52 }
 0x355   : > { %925 = vst.msk [vmem:[%s1494_s4 + $0xc8] sm:$0xff] %vm211_vm0, %v893_v31  ;;  %928 = vst.msk [vmem:[%s1494_s4 + $0xe0] sm:$0xff] %vm211_vm0, %v896_v5 }
 0x356   : > { %v851_v1 = vpop.permute.xlu1 %850  ;;  %v863_v0 = vpop.permute.xlu0 %862 }
 0x357   : > { %v895_v9 = vmul.f32 %v851_v1, %v1661_v59  ;;  %v898_v20 = vmul.f32 %v863_v0, %v1662_v17 }
 0x359   : > { %927 = vst.msk [vmem:[%s1494_s4 + $0xd8] sm:$0xff] %vm211_vm0, %v895_v9  ;;  %930 = vst.msk [vmem:[%s1494_s4 + $0xf0] sm:$0xff] %vm211_vm0, %v898_v20 }
 0x35a   : > { %v859_v10 = vpop.permute.xlu1 %858 }
 0x35b   : > { %v897_v25 = vmul.f32 %v859_v10, %v1663_v13 }
 0x35d   : > { %929 = vst.msk [vmem:[%s1494_s4 + $0xe8] sm:$0xff] %vm211_vm0, %v897_v25 }
 0x35e   : > { %v867_v14 = vpop.permute.xlu1 %866 }
 0x35f   : > { %v899_v21 = vmul.f32 %v867_v14, %v1664_v36 }
 0x361   : > { %931 = vst.msk [vmem:[%s1494_s4 + $0xf8] sm:$0xff] %vm211_vm0, %v899_v21 }
 0x362 PF: > { %s13_s12 = sadd.s32 1, %s1111_s12  }
 0x363   : > { %p10_p4 = scmp.ge.s32.totalorder %s13_s12, 6  }
 0x365   :  { %12 = sbr.rel (!%p10_p4) target bundleno = 1 (0x1), region = 62 }

</bundles_post_ra>
